<compile_context>
chip_gen: v7x
topology: tpu7x:2x2x1
jax: 0.10.0
libtpu: 0.0.40
codegen_flags: <defaults>
</compile_context>

<pallas_src>
import jax
import jax.numpy as jnp
from jax.experimental import pallas as pl
from jax.experimental.pallas import tpu as pltpu


def _round_up(x, m):
    return ((x + m - 1) // m) * m


def _feature_kernel(x_ref,
                    w1_ref, b1_ref,
                    w2_ref, b2_ref,
                    w3_ref, b3_ref,
                    out_ref):
    # x_ref: (tm, D) batch tile, natural row-major layout (no transposes).
    x = x_ref[...]
    w1 = w1_ref[...]                                     # (D, 128)

    # Layer 1: Linear(D, 128) + ReLU
    if x.shape[1] == 1:
        # K == 1 degenerate matmul -> VPU broadcast multiply (no MXU round trip)
        h1 = x * w1                                      # (tm,1)*(1,128) -> (tm,128)
    else:
        h1 = jnp.dot(x, w1, preferred_element_type=jnp.float32)
    h1 = jnp.maximum(h1 + b1_ref[...], 0.0)              # (tm, 128)

    # Layer 2: Linear(128, 64) + ReLU
    h2 = jnp.dot(h1, w2_ref[...], preferred_element_type=jnp.float32) + b2_ref[...]
    h2 = jnp.maximum(h2, 0.0)                            # (tm, 64)

    # Layer 3: Linear(64, 32) + ReLU
    h3 = jnp.dot(h2, w3_ref[...], preferred_element_type=jnp.float32) + b3_ref[...]
    h3 = jnp.maximum(h3, 0.0)                            # (tm, 32)

    out_ref[...] = h3


def feature_forward(data, params, *, tm=2048):
    """Feature.forward: data [N, D] -> features [N, 32] (dropout = identity)."""
    n, d = data.shape
    w1, b1, w2, b2, w3, b3 = params

    # Batch tile: multiple of 128 sublanes, clamped to the batch size.
    tm = max(128, _round_up(min(tm, n), 128))
    # Prefer >= 2 grid steps so the parallel axis can use both v7x TensorCores.
    if pl.cdiv(n, tm) < 2 and n > 128:
        tm = max(128, _round_up(pl.cdiv(n, 2), 128))
    grid = (pl.cdiv(n, tm),)

    # Constant index_map -> weight/bias blocks are fetched once and stay
    # resident in VMEM across all grid steps.
    full = lambda a: pl.BlockSpec(a.shape, lambda i: (0, 0))

    out = pl.pallas_call(
        _feature_kernel,
        out_shape=jax.ShapeDtypeStruct((n, 32), jnp.float32),
        grid_spec=pltpu.PrefetchScalarGridSpec(
            num_scalar_prefetch=0,
            grid=grid,
            in_specs=[
                pl.BlockSpec((tm, d), lambda i: (i, 0)),   # input tile (tm, D)
                full(w1), full(b1),
                full(w2), full(b2),
                full(w3), full(b3),
            ],
            out_specs=pl.BlockSpec((tm, 32), lambda i: (i, 0)),
        ),
        compiler_params=pltpu.CompilerParams(
            dimension_semantics=("parallel",)),
    )(data, w1, b1, w2, b2, w3, b3)

    return out                                           # (N, 32)


def init_params(key, n_input_dim):
    """PyTorch-style uniform(+-1/sqrt(fan_in)) init.

    Weights are stored as (in, out) so the kernel computes x @ W directly;
    biases are (1, out) so they broadcast along the batch (sublane) axis.
    """
    def linear(key, fan_in, fan_out):
        kw, kb = jax.random.split(key)
        bound = 1.0 / jnp.sqrt(fan_in)
        w = jax.random.uniform(kw, (fan_in, fan_out), jnp.float32, -bound, bound)
        b = jax.random.uniform(kb, (1, fan_out), jnp.float32, -bound, bound)
        return w, b

    k1, k2, k3 = jax.random.split(key, 3)
    w1, b1 = linear(k1, n_input_dim, 128)
    w2, b2 = linear(k2, 128, 64)
    w3, b3 = linear(k3, 64, 32)
    return (w1, b1, w2, b2, w3, b3)


def reference_forward(data, params):
    w1, b1, w2, b2, w3, b3 = params
    h = jnp.maximum(data @ w1 + b1, 0.0)
    h = jnp.maximum(h @ w2 + b2, 0.0)
    h = jnp.maximum(h @ w3 + b3, 0.0)
    return h


if __name__ == "__main__":
    key = jax.random.PRNGKey(0)

    # Case 1: low-dim treatment-style input (D=1), batch a multiple of 128
    # (exercises the VPU K==1 path; tile clamp gives a 2-step parallel grid).
    kp1, kx1, kp2, kx2 = jax.random.split(key, 4)
    params1 = init_params(kp1, 1)
    data1 = jax.random.normal(kx1, (256, 1), jnp.float32)
    out1 = feature_forward(data1, params1)
    jax.block_until_ready(out1)
    ref1 = reference_forward(data1, params1)
    assert out1.shape == (256, 32)
    assert jnp.allclose(out1, ref1, atol=1e-5, rtol=1e-5)

    # Case 2: D>1 and a ragged batch (exercises the MXU path and the masked
    # partial last block -- no wrapper-side padding).
    params2 = init_params(kp2, 8)
    data2 = jax.random.normal(kx2, (300, 8), jnp.float32)
    out2 = feature_forward(data2, params2)
    jax.block_until_ready(out2)
    ref2 = reference_forward(data2, params2)
    assert out2.shape == (300, 32)
    assert jnp.allclose(out2, ref2, atol=1e-5, rtol=1e-5)

    print("KERNEL_OK")
</pallas_src>

<mosaic_0001>
module attributes {stable_mosaic.version = 11 : i64} {
  func.func @_feature_kernel(%arg0: i32, %arg1: memref<128x1xf32, #tpu.memory_space<vmem>>, %arg2: memref<1x128xf32, #tpu.memory_space<vmem>>, %arg3: memref<1x128xf32, #tpu.memory_space<vmem>>, %arg4: memref<128x64xf32, #tpu.memory_space<vmem>>, %arg5: memref<1x64xf32, #tpu.memory_space<vmem>>, %arg6: memref<64x32xf32, #tpu.memory_space<vmem>>, %arg7: memref<1x32xf32, #tpu.memory_space<vmem>>, %arg8: memref<128x32xf32, #tpu.memory_space<vmem>>) attributes {dimension_semantics = [#tpu.dimension_semantics<parallel>], iteration_bounds = array<i64: 2>, scalar_prefetch = 0 : i64, scratch_operands = 0 : i64, tpu.core_type = #tpu.core_type<tc>, window_params = [{transform_indices = @transform_0, window_bounds = array<i64: 128, 1>}, {pipeline_mode = #tpu.pipeline_mode<synchronous>, transform_indices = @transform_1, window_bounds = array<i64: 1, 128>}, {pipeline_mode = #tpu.pipeline_mode<synchronous>, transform_indices = @transform_2, window_bounds = array<i64: 1, 128>}, {pipeline_mode = #tpu.pipeline_mode<synchronous>, transform_indices = @transform_3, window_bounds = array<i64: 128, 64>}, {pipeline_mode = #tpu.pipeline_mode<synchronous>, transform_indices = @transform_4, window_bounds = array<i64: 1, 64>}, {pipeline_mode = #tpu.pipeline_mode<synchronous>, transform_indices = @transform_5, window_bounds = array<i64: 64, 32>}, {pipeline_mode = #tpu.pipeline_mode<synchronous>, transform_indices = @transform_6, window_bounds = array<i64: 1, 32>}, {transform_indices = @transform_7, window_bounds = array<i64: 128, 32>}]} {
    %c0 = arith.constant 0 : index
    %c0_0 = arith.constant 0 : index
    %0 = vector.load %arg1[%c0, %c0_0] : memref<128x1xf32, #tpu.memory_space<vmem>>, vector<128x1xf32>
    %c0_1 = arith.constant 0 : index
    %c0_2 = arith.constant 0 : index
    %1 = vector.load %arg2[%c0_1, %c0_2] : memref<1x128xf32, #tpu.memory_space<vmem>>, vector<1x128xf32>
    %2 = vector.broadcast %0 : vector<128x1xf32> to vector<128x128xf32>
    %3 = vector.broadcast %1 : vector<1x128xf32> to vector<128x128xf32>
    %4 = arith.mulf %2, %3 : vector<128x128xf32>
    %c0_3 = arith.constant 0 : index
    %c0_4 = arith.constant 0 : index
    %5 = vector.load %arg3[%c0_3, %c0_4] : memref<1x128xf32, #tpu.memory_space<vmem>>, vector<1x128xf32>
    %6 = vector.broadcast %5 : vector<1x128xf32> to vector<128x128xf32>
    %7 = arith.addf %4, %6 : vector<128x128xf32>
    %cst = arith.constant 0.000000e+00 : f32
    %8 = vector.broadcast %cst : f32 to vector<128x128xf32>
    %9 = arith.maximumf %7, %8 : vector<128x128xf32>
    %c0_5 = arith.constant 0 : index
    %c0_6 = arith.constant 0 : index
    %10 = vector.load %arg4[%c0_5, %c0_6] : memref<128x64xf32, #tpu.memory_space<vmem>>, vector<128x64xf32>
    %cst_7 = arith.constant dense<0.000000e+00> : vector<128x64xf32>
    %11 = tpu.matmul %9, %10, %cst_7 {dimension_numbers = #tpu.dot_dimension_numbers<[1], [0], [0], [1], [0, 0, 1, 1], [], []>} : vector<128x128xf32>, vector<128x64xf32>, vector<128x64xf32> -> vector<128x64xf32>
    %c0_8 = arith.constant 0 : index
    %c0_9 = arith.constant 0 : index
    %12 = vector.load %arg5[%c0_8, %c0_9] : memref<1x64xf32, #tpu.memory_space<vmem>>, vector<1x64xf32>
    %13 = vector.broadcast %12 : vector<1x64xf32> to vector<128x64xf32>
    %14 = arith.addf %11, %13 : vector<128x64xf32>
    %cst_10 = arith.constant 0.000000e+00 : f32
    %15 = vector.broadcast %cst_10 : f32 to vector<128x64xf32>
    %16 = arith.maximumf %14, %15 : vector<128x64xf32>
    %c0_11 = arith.constant 0 : index
    %c0_12 = arith.constant 0 : index
    %17 = vector.load %arg6[%c0_11, %c0_12] : memref<64x32xf32, #tpu.memory_space<vmem>>, vector<64x32xf32>
    %cst_13 = arith.constant dense<0.000000e+00> : vector<128x32xf32>
    %18 = tpu.matmul %16, %17, %cst_13 {dimension_numbers = #tpu.dot_dimension_numbers<[1], [0], [0], [1], [0, 0, 1, 1], [], []>} : vector<128x64xf32>, vector<64x32xf32>, vector<128x32xf32> -> vector<128x32xf32>
    %c0_14 = arith.constant 0 : index
    %c0_15 = arith.constant 0 : index
    %19 = vector.load %arg7[%c0_14, %c0_15] : memref<1x32xf32, #tpu.memory_space<vmem>>, vector<1x32xf32>
    %20 = vector.broadcast %19 : vector<1x32xf32> to vector<128x32xf32>
    %21 = arith.addf %18, %20 : vector<128x32xf32>
    %cst_16 = arith.constant 0.000000e+00 : f32
    %22 = vector.broadcast %cst_16 : f32 to vector<128x32xf32>
    %23 = arith.maximumf %21, %22 : vector<128x32xf32>
    %c0_17 = arith.constant 0 : index
    %c0_18 = arith.constant 0 : index
    %24 = vector.load %arg8[%c0_17, %c0_18] : memref<128x32xf32, #tpu.memory_space<vmem>>, vector<128x32xf32>
    tpu.vector_store %arg8[%c0_17, %c0_18], %23 {strides = array<i32>} : memref<128x32xf32, #tpu.memory_space<vmem>>, vector<128x32xf32>,
    return
  }
  func.func @transform_0(%arg0: i32) -> (i32, i32) {
    %c0_i32 = arith.constant 0 : i32
    %c0_i32_0 = arith.constant 0 : i32
    return %arg0, %c0_i32 : i32, i32
  }
  func.func @transform_1(%arg0: i32) -> (i32, i32) {
    %c0_i32 = arith.constant 0 : i32
    %c0_i32_0 = arith.constant 0 : i32
    %c0_i32_1 = arith.constant 0 : i32
    return %c0_i32, %c0_i32_0 : i32, i32
  }
  func.func @transform_2(%arg0: i32) -> (i32, i32) {
    %c0_i32 = arith.constant 0 : i32
    %c0_i32_0 = arith.constant 0 : i32
    %c0_i32_1 = arith.constant 0 : i32
    return %c0_i32, %c0_i32_0 : i32, i32
  }
  func.func @transform_3(%arg0: i32) -> (i32, i32) {
    %c0_i32 = arith.constant 0 : i32
    %c0_i32_0 = arith.constant 0 : i32
    %c0_i32_1 = arith.constant 0 : i32
    return %c0_i32, %c0_i32_0 : i32, i32
  }
  func.func @transform_4(%arg0: i32) -> (i32, i32) {
    %c0_i32 = arith.constant 0 : i32
    %c0_i32_0 = arith.constant 0 : i32
    %c0_i32_1 = arith.constant 0 : i32
    return %c0_i32, %c0_i32_0 : i32, i32
  }
  func.func @transform_5(%arg0: i32) -> (i32, i32) {
    %c0_i32 = arith.constant 0 : i32
    %c0_i32_0 = arith.constant 0 : i32
    %c0_i32_1 = arith.constant 0 : i32
    return %c0_i32, %c0_i32_0 : i32, i32
  }
  func.func @transform_6(%arg0: i32) -> (i32, i32) {
    %c0_i32 = arith.constant 0 : i32
    %c0_i32_0 = arith.constant 0 : i32
    %c0_i32_1 = arith.constant 0 : i32
    return %c0_i32, %c0_i32_0 : i32, i32
  }
  func.func @transform_7(%arg0: i32) -> (i32, i32) {
    %c0_i32 = arith.constant 0 : i32
    %c0_i32_0 = arith.constant 0 : i32
    return %arg0, %c0_i32 : i32, i32
  }
}

</mosaic_0001>

<bundles_post_ra>
// kernel: tpu_custom_call.1
= control target key start
LH: loop header
LB: loop body
LE: loop exit
PB: predicated region body
PF: predicated region fallthrough
CT: control target
= control target key end

     0   :  { %s1213_s24 = smov 0   ;;  %s1425_s0 = inlined_call_operand.vmem [shape: f32[256,1], index: 0, kind: input, shape index: {}]   ;;  %s1426_s1 = inlined_call_operand.vmem [shape: f32[1,128], index: 1, kind: input, shape index: {}]   ;;  %s1427_s2 = inlined_call_operand.vmem [shape: f32[1,128], index: 2, kind: input, shape index: {}]   ;;  %s1428_s3 = inlined_call_operand.vmem [shape: f32[128,64], index: 3, kind: input, shape index: {}]   ;;  %s1429_s4 = inlined_call_operand.vmem [shape: f32[1,64], index: 4, kind: input, shape index: {}]   ;;  %s1430_s5 = inlined_call_operand.vmem [shape: f32[64,32], index: 5, kind: input, shape index: {}]   ;;  %s1431_s6 = inlined_call_operand.vmem [shape: f32[1,32], index: 6, kind: input, shape index: {}]   ;;  %s1432_s7 = inlined_call_operand.vmem [shape: f32[256,32], index: 7, kind: output, shape index: {}]  }
   0x1 LB: > { %s922_s25 = sadd.s32 4294967295, %s1170_s24   ;;  %p926_p0 = scmp.ge.s32.totalorder %s1170_s24, 1  ;;  %s1170_s24 = sphi %s1213_s24, %s17_s24  }
   0x2   : > { %p238_p1 = scmp.lt.s32.totalorder %s1170_s24, 3 }
   0x4   : > { %p239_p2 = pnand %p926_p0, %p238_p1 }
   0x5   : > { %s927_s26 = sshll.u32 (!%p239_p2), %s922_s25, 4  ;;  %v440_v0 = vld [vmem:[%s1428_s3] sm:$0xff] (!%p239_p2)  ;;  %v441_v1 = vld [vmem:[%s1428_s3 + $0x8] sm:$0xff] (!%p239_p2)  ;;  %v442_v2 = vld [vmem:[%s1428_s3 + $0x10] sm:$0xff] (!%p239_p2)  ;;  %v1172_v3 = vmov (!%p239_p2), 0   ;;  %vm639_vm0 = vcmask (!%p239_p2), 523264  }
   0x6   : > { %242 = sbr.rel (%p239_p2) target bundleno = 619 (0x26b), region = 48  ;;  %1163 = vset.pattern.permute.xlu1 (!%p239_p2), %v1172_v3  ;;  %1162 = vset.pattern.permute.xlu0 (!%p239_p2), %v1172_v3  ;;  %p271_p3 = scmp.lt.s32.totalorder (!%p239_p2), %s927_s26, 31  ;;  %v1105_v4 = vpack.c.bf16 (!%p239_p2), %v441_v1, %v440_v0  ;;  %v443_v5 = vld [vmem:[%s1428_s3 + $0x18] sm:$0xff] (!%p239_p2)  ;;  %v444_v7 = vld [vmem:[%s1428_s3 + $0x20] sm:$0xff] (!%p239_p2)  ;;  %v445_v8 = vld [vmem:[%s1428_s3 + $0x28] sm:$0xff] (!%p239_p2)  ;;  %vm849_vm1 = vcmask (!%p239_p2), 261120  }
   0x7   : > { %v1109_v6 = vpack.c.bf16 (!%p239_p2), %v443_v5, %v442_v2  ;;  %v1113_v9 = vpack.c.bf16 (!%p239_p2), %v445_v8, %v444_v7  ;;  %v446_v10 = vld [vmem:[%s1428_s3 + $0x30] sm:$0xff] (!%p239_p2)  ;;  %v447_v13 = vld [vmem:[%s1428_s3 + $0x38] sm:$0xff] (!%p239_p2)  ;;  %v448_v17 = vld [vmem:[%s1428_s3 + $0x40] sm:$0xff] (!%p239_p2) }
   0x8   : > { %1106 = vmatprep.subr.bf16.mxu0 (!%p239_p2), %v1105_v4  ;;  %v1117_v16 = vpack.c.bf16 (!%p239_p2), %v447_v13, %v446_v10  ;;  %v449_v18 = vld [vmem:[%s1428_s3 + $0x48] sm:$0xff] (!%p239_p2)  ;;  %v450_v22 = vld [vmem:[%s1428_s3 + $0x50] sm:$0xff] (!%p239_p2)  ;;  %v451_v23 = vld [vmem:[%s1428_s3 + $0x58] sm:$0xff] (!%p239_p2) }
   0x9   : > { %1108 = vmatpush3.bf16.msra.mxu0 (!%p239_p2), %v1105_v4  ;;  %v1121_v21 = vpack.c.bf16 (!%p239_p2), %v449_v18, %v448_v17  ;;  %v1125_v26 = vpack.c.bf16 (!%p239_p2), %v451_v23, %v450_v22  ;;  %v452_v27 = vld [vmem:[%s1428_s3 + $0x60] sm:$0xff] (!%p239_p2)  ;;  %v453_v28 = vld [vmem:[%s1428_s3 + $0x68] sm:$0xff] (!%p239_p2)  ;;  %v454_v32 = vld [vmem:[%s1428_s3 + $0x70] sm:$0xff] (!%p239_p2) }
   0xa   : > { %1110 = vmatprep.subr.bf16.mxu0 (!%p239_p2), %v1109_v6  ;;  %v1129_v31 = vpack.c.bf16 (!%p239_p2), %v453_v28, %v452_v27  ;;  %v455_v33 = vld [vmem:[%s1428_s3 + $0x78] sm:$0xff] (!%p239_p2)  ;;  %v624_v41 = vld [vmem:[%s1430_s5] sm:$0xff] (!%p239_p2)  ;;  %v625_v42 = vld [vmem:[%s1430_s5 + $0x8] sm:$0xff] (!%p239_p2) }
   0xb   : > { %v1133_v36 = vpack.c.bf16 (!%p239_p2), %v455_v33, %v454_v32  ;;  %v626_v43 = vld [vmem:[%s1430_s5 + $0x10] sm:$0xff] (!%p239_p2)  ;;  %v1137_v44 = vpack.c.bf16 (!%p239_p2), %v625_v42, %v624_v41  ;;  %v627_v45 = vld [vmem:[%s1430_s5 + $0x18] sm:$0xff] (!%p239_p2)  ;;  %v628_v47 = vld [vmem:[%s1430_s5 + $0x20] sm:$0xff] (!%p239_p2) }
   0xc   : > { %v1141_v46 = vpack.c.bf16 (!%p239_p2), %v627_v45, %v626_v43  ;;  %v629_v48 = vld [vmem:[%s1430_s5 + $0x28] sm:$0xff] (!%p239_p2)  ;;  %v1316_v50 = vld [vmem:[%s1426_s1] ss:$0 sm:$0xff] (!%p239_p2) }
   0xd   : > { %s1434_s26 = smov (!%p271_p3, %s927_s26), 31  ;;  %1112 = vmatpush3.bf16.msra.mxu0 %v1109_v6  ;;  %1138 = vmatprep.subr.bf16.mxu1 %v1137_v44  ;;  %v1145_v49 = vpack.c.bf16 %v629_v48, %v628_v47  ;;  %v1321_v51 = vld [vmem:[%s1427_s2] ss:$0 sm:$0xff] }
   0xe   : > { %s928_s16 = sshll.u32 %s1434_s26, 3  ;;  %1114 = vmatprep.subr.bf16.mxu0 %v1113_v9  ;;  %1140 = vmatpush3.bf16.msra.mxu1 %v1137_v44 }
   0xf   : > { %s1247_s19 = scalar_lea.vmem %s1425_s0, %s928_s16  ;;  %1142 = vmatprep.subr.bf16.mxu1 %v1141_v46  ;;  %s1388_s29 = scalar_lea.vmem %s1432_s7, %s928_s16 }
  0x10   : > { %v284_v11 = vld [vmem:[%s1247_s19 + $0x10] sm:$0xff]  ;;  %v282_v12 = vld [vmem:[%s1247_s19] sm:$0xff]  ;;  %v285_v14 = vld [vmem:[%s1247_s19 + $0x18] sm:$0xff] }
  0x11   : > { %311 = vperm.xlu1 %1163, %v284_v11   ;;  %301 = vperm.xlu0 %1162, %v282_v12   ;;  %v283_v15 = vld [vmem:[%s1247_s19 + $0x8] sm:$0xff]  ;;  %v286_v20 = vld [vmem:[%s1247_s19 + $0x20] sm:$0xff]  ;;  %v289_v24 = vld [vmem:[%s1247_s19 + $0x38] sm:$0xff] }
  0x12   : > { %v287_v19 = vld [vmem:[%s1247_s19 + $0x28] sm:$0xff]  ;;  %1116 = vmatpush3.bf16.msra.mxu0 %v1113_v9  ;;  %v288_v25 = vld [vmem:[%s1247_s19 + $0x30] sm:$0xff]  ;;  %v290_v30 = vld [vmem:[%s1247_s19 + $0x40] sm:$0xff]  ;;  %1144 = vmatpush3.bf16.msra.mxu1 %v1141_v46 }
  0x13   : > { %1118 = vmatprep.subr.bf16.mxu0 %v1117_v16  ;;  %v291_v29 = vld [vmem:[%s1247_s19 + $0x48] sm:$0xff]  ;;  %v293_v34 = vld [vmem:[%s1247_s19 + $0x58] sm:$0xff]  ;;  %v292_v35 = vld [vmem:[%s1247_s19 + $0x50] sm:$0xff]  ;;  %1146 = vmatprep.subr.bf16.mxu1 %v1145_v49 }
  0x14   : > { %v295_v37 = vld [vmem:[%s1247_s19 + $0x68] sm:$0xff]  ;;  %v294_v38 = vld [vmem:[%s1247_s19 + $0x60] sm:$0xff]  ;;  %v297_v39 = vld [vmem:[%s1247_s19 + $0x78] sm:$0xff] }
  0x15   : > { %316 = vperm.xlu1 %1163, %v285_v14   ;;  %306 = vperm.xlu0 %1162, %v283_v15   ;;  %v296_v40 = vld [vmem:[%s1247_s19 + $0x70] sm:$0xff] }
  0x16   : > { %1120 = vmatpush3.bf16.msra.mxu0 %v1117_v16  ;;  %1148 = vmatpush3.bf16.msra.mxu1 %v1145_v49 }
  0x17   : > { %1122 = vmatprep.subr.bf16.mxu0 %v1121_v21 }
  0x19   : > { %326 = vperm.xlu1 %1163, %v287_v19   ;;  %321 = vperm.xlu0 %1162, %v286_v20  }
  0x1a   : > { %1124 = vmatpush3.bf16.msra.mxu0 %v1121_v21 }
  0x1b   : > { %1126 = vmatprep.subr.bf16.mxu0 %v1125_v26 }
  0x1d   : > { %336 = vperm.xlu1 %1163, %v289_v24   ;;  %331 = vperm.xlu0 %1162, %v288_v25  }
  0x1e   : > { %1128 = vmatpush3.bf16.msra.mxu0 %v1125_v26 }
  0x1f   : > { %1130 = vmatprep.subr.bf16.mxu0 %v1129_v31 }
  0x21   : > { %346 = vperm.xlu1 %1163, %v291_v29   ;;  %341 = vperm.xlu0 %1162, %v290_v30  }
  0x22   : > { %1132 = vmatpush3.bf16.msra.mxu0 %v1129_v31 }
  0x23   : > { %1134 = vmatprep.subr.bf16.mxu0 %v1133_v36 }
  0x25   : > { %356 = vperm.xlu1 %1163, %v293_v34   ;;  %351 = vperm.xlu0 %1162, %v292_v35  }
  0x26   : > { %1136 = vmatpush3.bf16.msra.mxu0 %v1133_v36 }
  0x29   : > { %366 = vperm.xlu1 %1163, %v295_v37   ;;  %361 = vperm.xlu0 %1162, %v294_v38  }
  0x2d   : > { %376 = vperm.xlu1 %1163, %v297_v39   ;;  %371 = vperm.xlu0 %1162, %v296_v40  }
  0x90   : > { %v312_v52 = vpop.permute.xlu1 %311  ;;  %v302_v53 = vpop.permute.xlu0 %301 }
  0x91   : > { %v387_v54 = vmul.f32 %v1316_v50, %v312_v52  ;;  %v385_v55 = vmul.f32 %v1316_v50, %v302_v53 }
  0x93   : > { %v408_v56 = vadd.f32 %v1321_v51, %v385_v55  ;;  %v410_v57 = vadd.f32 %v1321_v51, %v387_v54  ;;  %v630_v54 = vld [vmem:[%s1430_s5 + $0x30] sm:$0xff] }
  0x94   : > { %v317_v58 = vpop.permute.xlu1 %316  ;;  %v307_v59 = vpop.permute.xlu0 %306 }
  0x95   : > { %v388_v60 = vmul.f32 %v1316_v50, %v317_v58  ;;  %v386_v61 = vmul.f32 %v1316_v50, %v307_v59  ;;  %v424_v62 = vmax.f32 %v408_v56, 0.0  ;;  %v426_v0 = vmax.f32 %v410_v57, 0.0 }
  0x97   : > { %v409_v63 = vadd.f32 %v1321_v51, %v386_v61  ;;  %1041 = vmatprep.mubr.f32.mxu0 %v424_v62  ;;  %v411_v1 = vadd.f32 %v1321_v51, %v388_v60 }
  0x98   : > { %v327_v2 = vpop.permute.xlu1 %326  ;;  %v322_v3 = vpop.permute.xlu0 %321 }
  0x99   : > { %v425_v4 = vmax.f32 %v409_v63, 0.0  ;;  %v390_v5 = vmul.f32 %v1316_v50, %v327_v2  ;;  %v389_v6 = vmul.f32 %v1316_v50, %v322_v3  ;;  %v427_v8 = vmax.f32 %v411_v1, 0.0 }
  0x9b   : > { %v412_v7 = vadd.f32 %v1321_v51, %v389_v6  ;;  %1042 = vmatmul.mubr.f32.vlgmr.msra.gmra.mrb[0].mxu0 %v425_v4  ;;  %v413_v11 = vadd.f32 %v1321_v51, %v390_v5 }
  0x9c   : > { %v337_v9 = vpop.permute.xlu1 %336  ;;  %1044 = vmatprep.mubr.f32.mxu0 %v426_v0  ;;  %v332_v10 = vpop.permute.xlu0 %331 }
  0x9d   : > { %v428_v12 = vmax.f32 %v412_v7, 0.0  ;;  %v392_v13 = vmul.f32 %v1316_v50, %v337_v9  ;;  %v391_v14 = vmul.f32 %v1316_v50, %v332_v10  ;;  %v429_v19 = vmax.f32 %v413_v11, 0.0 }
  0x9f   : > { %v414_v15 = vadd.f32 %v1321_v51, %v391_v14  ;;  %1045 = vmatmul.mubr.f32.gmra.mrb[2].mxu0 %v427_v8  ;;  %v415_v16 = vadd.f32 %v1321_v51, %v392_v13 }
  0xa0   : > { %v347_v17 = vpop.permute.xlu1 %346  ;;  %1047 = vmatprep.mubr.f32.mxu0 %v428_v12  ;;  %v342_v18 = vpop.permute.xlu0 %341 }
  0xa1   : > { %v430_v20 = vmax.f32 %v414_v15, 0.0  ;;  %v394_v21 = vmul.f32 %v1316_v50, %v347_v17  ;;  %v393_v22 = vmul.f32 %v1316_v50, %v342_v18  ;;  %v431_v24 = vmax.f32 %v415_v16, 0.0 }
  0xa3   : > { %v416_v23 = vadd.f32 %v1321_v51, %v393_v22  ;;  %1048 = vmatmul.mubr.f32.gmra.mrb[4].mxu0 %v429_v19  ;;  %v417_v27 = vadd.f32 %v1321_v51, %v394_v21 }
  0xa4   : > { %v357_v25 = vpop.permute.xlu1 %356  ;;  %1050 = vmatprep.mubr.f32.mxu0 %v430_v20  ;;  %v352_v26 = vpop.permute.xlu0 %351 }
  0xa5   : > { %v432_v28 = vmax.f32 %v416_v23, 0.0  ;;  %v396_v29 = vmul.f32 %v1316_v50, %v357_v25  ;;  %v395_v30 = vmul.f32 %v1316_v50, %v352_v26  ;;  %v433_v35 = vmax.f32 %v417_v27, 0.0 }
  0xa7   : > { %v418_v31 = vadd.f32 %v1321_v51, %v395_v30  ;;  %1051 = vmatmul.mubr.f32.gmra.mrb[6].mxu0 %v431_v24  ;;  %v419_v32 = vadd.f32 %v1321_v51, %v396_v29 }
  0xa8   : > { %v367_v33 = vpop.permute.xlu1 %366  ;;  %1053 = vmatprep.mubr.f32.mxu0 %v432_v28  ;;  %v362_v34 = vpop.permute.xlu0 %361 }
  0xa9   : > { %v434_v36 = vmax.f32 %v418_v31, 0.0  ;;  %v398_v37 = vmul.f32 %v1316_v50, %v367_v33  ;;  %v397_v38 = vmul.f32 %v1316_v50, %v362_v34  ;;  %v435_v40 = vmax.f32 %v419_v32, 0.0 }
  0xab   : > { %v420_v39 = vadd.f32 %v1321_v51, %v397_v38  ;;  %1054 = vmatmul.mubr.f32.gmra.mrb[8].mxu0 %v433_v35  ;;  %v421_v43 = vadd.f32 %v1321_v51, %v398_v37 }
  0xac   : > { %v377_v41 = vpop.permute.xlu1 %376  ;;  %1056 = vmatprep.mubr.f32.mxu0 %v434_v36  ;;  %v372_v42 = vpop.permute.xlu0 %371 }
  0xad   : > { %v436_v44 = vmax.f32 %v420_v39, 0.0  ;;  %v400_v45 = vmul.f32 %v1316_v50, %v377_v41  ;;  %v399_v46 = vmul.f32 %v1316_v50, %v372_v42  ;;  %v437_v48 = vmax.f32 %v421_v43, 0.0  ;;  %v631_v50 = vld [vmem:[%s1430_s5 + $0x38] sm:$0xff] }
  0xae   : > { %v1149_v55 = vpack.c.bf16 %v631_v50, %v630_v54 }
  0xaf   : > { %v422_v47 = vadd.f32 %v1321_v51, %v399_v46  ;;  %1057 = vmatmul.mubr.f32.gmra.mrb[10].mxu0 %v435_v40  ;;  %v423_v49 = vadd.f32 %v1321_v51, %v400_v45  ;;  %v933_v51 = vld [vmem:[%s1429_s4] ss:$0 sm:$0xff] }
  0xb0   : > { %1059 = vmatprep.mubr.f32.mxu0 %v436_v44  ;;  %1150 = vmatprep.subr.bf16.mxu1 %v1149_v55  ;;  %v934_v40 = vld [vmem:[%s1431_s6] ss:$0 sm:$0xff] }
  0xb1   : > { %v438_v52 = vmax.f32 %v422_v47, 0.0  ;;  %v439_v53 = vmax.f32 %v423_v49, 0.0  ;;  %1152 = vmatpush3.bf16.msra.mxu1 %v1149_v55 }
  0xb3   : > { %1060 = vmatmul.mubr.f32.gmra.mrb[12].mxu0 %v437_v48 }
  0xb4   : > { %1062 = vmatprep.mubr.f32.mxu0 %v438_v52 }
  0xb7   : > { %1063 = vmatmul.mubr.f32.gmra.mrb[14].mxu0 %v439_v53 }
 0x16e   : > { %v1043_v56 = vpop.f32.mrb[0].mxu0 }
 0x16f   : > { %v535_v57 = vadd.f32 %v1043_v56, %v933_v51  ;;  %v529_v58 = vpop.f32.mrb[1].mxu0 }
 0x170   : > { %v530_v59 = vadd.f32 %v933_v51, %v529_v58 }
 0x171   : > { %v609_v62 = vmax.f32 %v535_v57, 0.0 }
 0x172   : > { %v608_v60 = vmax.f32 %v530_v59, 0.0  ;;  %v1046_v61 = vpop.f32.mrb[2].mxu0 }
 0x173   : > { %v545_v63 = vadd.f32 %v1046_v61, %v933_v51  ;;  %v539_v0 = vpop.f32.mrb[3].mxu0 }
 0x174   : > { %v540_v1 = vadd.f32 %v933_v51, %v539_v0  ;;  %1081 = vmatprep.mubr.msk.f32.mxu1 %vm639_vm0, %v608_v60 }
 0x175   : > { %1082 = vmatmul.mubr.msk.f32.vlgmr.msra.gmra.mrb[0].mxu1 %vm639_vm0, %v609_v62  ;;  %v611_v4 = vmax.f32 %v545_v63, 0.0 }
 0x176   : > { %v610_v2 = vmax.f32 %v540_v1, 0.0  ;;  %v1049_v3 = vpop.f32.mrb[4].mxu0 }
 0x177   : > { %v555_v5 = vadd.f32 %v1049_v3, %v933_v51  ;;  %v549_v6 = vpop.f32.mrb[5].mxu0 }
 0x178   : > { %v550_v7 = vadd.f32 %v933_v51, %v549_v6  ;;  %1084 = vmatprep.mubr.msk.f32.mxu1 %vm639_vm0, %v610_v2 }
 0x179   : > { %1085 = vmatmul.mubr.msk.f32.gmra.mrb[2].mxu1 %vm639_vm0, %v611_v4  ;;  %v613_v10 = vmax.f32 %v555_v5, 0.0 }
 0x17a   : > { %v612_v8 = vmax.f32 %v550_v7, 0.0  ;;  %v1052_v9 = vpop.f32.mrb[6].mxu0 }
 0x17b   : > { %v565_v11 = vadd.f32 %v1052_v9, %v933_v51  ;;  %v559_v12 = vpop.f32.mrb[7].mxu0 }
 0x17c   : > { %v560_v13 = vadd.f32 %v933_v51, %v559_v12  ;;  %1087 = vmatprep.mubr.msk.f32.mxu1 %vm639_vm0, %v612_v8 }
 0x17d   : > { %1088 = vmatmul.mubr.msk.f32.gmra.mrb[4].mxu1 %vm639_vm0, %v613_v10  ;;  %v615_v16 = vmax.f32 %v565_v11, 0.0 }
 0x17e   : > { %v614_v14 = vmax.f32 %v560_v13, 0.0  ;;  %v1055_v15 = vpop.f32.mrb[8].mxu0 }
 0x17f   : > { %v575_v17 = vadd.f32 %v1055_v15, %v933_v51  ;;  %v569_v18 = vpop.f32.mrb[9].mxu0 }
 0x180   : > { %v570_v19 = vadd.f32 %v933_v51, %v569_v18  ;;  %1090 = vmatprep.mubr.msk.f32.mxu1 %vm639_vm0, %v614_v14 }
 0x181   : > { %1091 = vmatmul.mubr.msk.f32.gmra.mrb[6].mxu1 %vm639_vm0, %v615_v16  ;;  %v617_v22 = vmax.f32 %v575_v17, 0.0 }
 0x182   : > { %v616_v20 = vmax.f32 %v570_v19, 0.0  ;;  %v1058_v21 = vpop.f32.mrb[10].mxu0 }
 0x183   : > { %v585_v23 = vadd.f32 %v1058_v21, %v933_v51  ;;  %v579_v24 = vpop.f32.mrb[11].mxu0 }
 0x184   : > { %v580_v25 = vadd.f32 %v933_v51, %v579_v24  ;;  %1093 = vmatprep.mubr.msk.f32.mxu1 %vm639_vm0, %v616_v20 }
 0x185   : > { %1094 = vmatmul.mubr.msk.f32.gmra.mrb[8].mxu1 %vm639_vm0, %v617_v22  ;;  %v619_v28 = vmax.f32 %v585_v23, 0.0 }
 0x186   : > { %v618_v26 = vmax.f32 %v580_v25, 0.0  ;;  %v1061_v27 = vpop.f32.mrb[12].mxu0 }
 0x187   : > { %v595_v29 = vadd.f32 %v1061_v27, %v933_v51  ;;  %v589_v30 = vpop.f32.mrb[13].mxu0 }
 0x188   : > { %v590_v31 = vadd.f32 %v933_v51, %v589_v30  ;;  %1096 = vmatprep.mubr.msk.f32.mxu1 %vm639_vm0, %v618_v26 }
 0x189   : > { %1097 = vmatmul.mubr.msk.f32.gmra.mrb[10].mxu1 %vm639_vm0, %v619_v28  ;;  %v621_v34 = vmax.f32 %v595_v29, 0.0 }
 0x18a   : > { %v620_v32 = vmax.f32 %v590_v31, 0.0  ;;  %v1064_v33 = vpop.f32.mrb[14].mxu0 }
 0x18b   : > { %v605_v35 = vadd.f32 %v1064_v33, %v933_v51  ;;  %v599_v36 = vpop.f32.mrb[15].mxu0 }
 0x18c   : > { %v600_v37 = vadd.f32 %v933_v51, %v599_v36  ;;  %1099 = vmatprep.mubr.msk.f32.mxu1 %vm639_vm0, %v620_v32 }
 0x18d   : > { %1100 = vmatmul.mubr.msk.f32.gmra.mrb[12].mxu1 %vm639_vm0, %v621_v34  ;;  %v623_v39 = vmax.f32 %v605_v35, 0.0 }
 0x18e   : > { %v622_v38 = vmax.f32 %v600_v37, 0.0 }
 0x190   : > { %1102 = vmatprep.mubr.msk.f32.mxu1 %vm639_vm0, %v622_v38 }
 0x191   : > { %1103 = vmatmul.mubr.msk.f32.gmra.mrb[14].mxu1 %vm639_vm0, %v623_v39 }
 0x248   : > { %v1083_v41 = vpop.f32.mrb[0].mxu1 }
 0x249   : > { %v760_v42 = vadd.f32 %v1083_v41, %v934_v40  ;;  %v754_v43 = vpop.f32.mrb[1].mxu1 }
 0x24a   : > { %v755_v44 = vadd.f32 %v934_v40, %v754_v43 }
 0x24b   : > { %v834_v45 = vmax.f32 %v760_v42, 0.0 }
 0x24c   : > { %v833_v46 = vmax.f32 %v755_v44, 0.0  ;;  %v1086_v47 = vpop.f32.mrb[2].mxu1 }
 0x24d   : > { %851 = vst.msk [vmem:[%s1388_s29 + $0x8] sm:$0xff] %vm849_vm1, %v834_v45  ;;  %v770_v48 = vadd.f32 %v1086_v47, %v934_v40  ;;  %v764_v49 = vpop.f32.mrb[3].mxu1 }
 0x24e   : > { %850 = vst.msk [vmem:[%s1388_s29] sm:$0xff] %vm849_vm1, %v833_v46  ;;  %v765_v52 = vadd.f32 %v934_v40, %v764_v49 }
 0x24f   : > { %v836_v53 = vmax.f32 %v770_v48, 0.0 }
 0x250   : > { %v835_v54 = vmax.f32 %v765_v52, 0.0  ;;  %v1089_v50 = vpop.f32.mrb[4].mxu1 }
 0x251   : > { %853 = vst.msk [vmem:[%s1388_s29 + $0x18] sm:$0xff] %vm849_vm1, %v836_v53  ;;  %v780_v55 = vadd.f32 %v1089_v50, %v934_v40  ;;  %v774_v51 = vpop.f32.mrb[5].mxu1 }
 0x252   : > { %852 = vst.msk [vmem:[%s1388_s29 + $0x10] sm:$0xff] %vm849_vm1, %v835_v54  ;;  %v775_v56 = vadd.f32 %v934_v40, %v774_v51 }
 0x253   : > { %v838_v57 = vmax.f32 %v780_v55, 0.0 }
 0x254   : > { %v837_v58 = vmax.f32 %v775_v56, 0.0  ;;  %v1092_v59 = vpop.f32.mrb[6].mxu1 }
 0x255   : > { %855 = vst.msk [vmem:[%s1388_s29 + $0x28] sm:$0xff] %vm849_vm1, %v838_v57  ;;  %v790_v60 = vadd.f32 %v1092_v59, %v934_v40  ;;  %v784_v61 = vpop.f32.mrb[7].mxu1 }
 0x256   : > { %854 = vst.msk [vmem:[%s1388_s29 + $0x20] sm:$0xff] %vm849_vm1, %v837_v58  ;;  %v785_v62 = vadd.f32 %v934_v40, %v784_v61 }
 0x257   : > { %v840_v63 = vmax.f32 %v790_v60, 0.0 }
 0x258   : > { %v839_v0 = vmax.f32 %v785_v62, 0.0  ;;  %v1095_v1 = vpop.f32.mrb[8].mxu1 }
 0x259   : > { %857 = vst.msk [vmem:[%s1388_s29 + $0x38] sm:$0xff] %vm849_vm1, %v840_v63  ;;  %v800_v2 = vadd.f32 %v1095_v1, %v934_v40  ;;  %v794_v3 = vpop.f32.mrb[9].mxu1 }
 0x25a   : > { %856 = vst.msk [vmem:[%s1388_s29 + $0x30] sm:$0xff] %vm849_vm1, %v839_v0  ;;  %v795_v4 = vadd.f32 %v934_v40, %v794_v3 }
 0x25b   : > { %v842_v5 = vmax.f32 %v800_v2, 0.0 }
 0x25c   : > { %v841_v6 = vmax.f32 %v795_v4, 0.0  ;;  %v1098_v7 = vpop.f32.mrb[10].mxu1 }
 0x25d   : > { %859 = vst.msk [vmem:[%s1388_s29 + $0x48] sm:$0xff] %vm849_vm1, %v842_v5  ;;  %v810_v8 = vadd.f32 %v1098_v7, %v934_v40  ;;  %v804_v9 = vpop.f32.mrb[11].mxu1 }
 0x25e   : > { %858 = vst.msk [vmem:[%s1388_s29 + $0x40] sm:$0xff] %vm849_vm1, %v841_v6  ;;  %v805_v10 = vadd.f32 %v934_v40, %v804_v9 }
 0x25f   : > { %v844_v11 = vmax.f32 %v810_v8, 0.0 }
 0x260   : > { %v843_v12 = vmax.f32 %v805_v10, 0.0  ;;  %v1101_v13 = vpop.f32.mrb[12].mxu1 }
 0x261   : > { %861 = vst.msk [vmem:[%s1388_s29 + $0x58] sm:$0xff] %vm849_vm1, %v844_v11  ;;  %v820_v14 = vadd.f32 %v1101_v13, %v934_v40  ;;  %v814_v15 = vpop.f32.mrb[13].mxu1 }
 0x262   : > { %860 = vst.msk [vmem:[%s1388_s29 + $0x50] sm:$0xff] %vm849_vm1, %v843_v12  ;;  %v815_v16 = vadd.f32 %v934_v40, %v814_v15 }
 0x263   : > { %v846_v17 = vmax.f32 %v820_v14, 0.0 }
 0x264   : > { %v845_v18 = vmax.f32 %v815_v16, 0.0  ;;  %v1104_v19 = vpop.f32.mrb[14].mxu1 }
 0x265   : > { %863 = vst.msk [vmem:[%s1388_s29 + $0x68] sm:$0xff] %vm849_vm1, %v846_v17  ;;  %v830_v20 = vadd.f32 %v1104_v19, %v934_v40  ;;  %v824_v21 = vpop.f32.mrb[15].mxu1 }
 0x266   : > { %862 = vst.msk [vmem:[%s1388_s29 + $0x60] sm:$0xff] %vm849_vm1, %v845_v18  ;;  %v825_v22 = vadd.f32 %v934_v40, %v824_v21 }
 0x267   : > { %v848_v23 = vmax.f32 %v830_v20, 0.0 }
 0x268   : > { %v847_v24 = vmax.f32 %v825_v22, 0.0 }
 0x269   : > { %865 = vst.msk [vmem:[%s1388_s29 + $0x78] sm:$0xff] %vm849_vm1, %v848_v23 }
 0x26a   : > { %864 = vst.msk [vmem:[%s1388_s29 + $0x70] sm:$0xff] %vm849_vm1, %v847_v24 }
 0x26b PF: > { %s17_s24 = sadd.s32 1, %s1170_s24  }
 0x26c   : > { %p14_p4 = scmp.ge.s32.totalorder %s17_s24, 4  }
 0x26e   :  { %16 = sbr.rel (!%p14_p4) target bundleno = 1 (0x1), region = 78 }

</bundles_post_ra>
